<compile_context>
chip_gen: v5e
topology: v5e:2x2
jax: 0.10.0
libtpu: 0.0.40
codegen_flags: <defaults>
</compile_context>

<pallas_src>
import jax
import jax.numpy as jnp
from jax.experimental import pallas as pl
from jax.experimental.pallas import tpu as pltpu

# synthetic cfg values (small, consistent with the module)
EMBED_DIM = 16      # cfg.TEXT.EMBEDDING_DIM  (t_dim)
COND_DIM = 8        # cfg.GAN.CONDITION_DIM   (c_dim)
BATCH = 2

_LANE = 128
_MIN_TM = 512       # row tiles >= 512 reach ~85% of HBM roofline (measured)
_MAX_TM = 4096      # keeps 2x(in + h + out) per tile well under scoped VMEM everywhere


def _ca_net_kernel(x_ref, w_ref, b_ref, eps_ref, out_ref):
    """Fused Linear(+bias) -> GLU -> split -> reparametrize, batch on the lane axis.

    x_ref   : (tm, t_dim)
    w_ref   : (4*c_dim, t_dim)   torch nn.Linear weight layout, used directly
    b_ref   : (4*c_dim, 1)       f32
    eps_ref : (c_dim, tm)
    out_ref : (3*c_dim, tm)      rows [0:c)=c_code, [c:2c)=mu, [2c:3c)=logvar
    """
    # (4c, t_dim) x (tm, t_dim), contracting t_dim -> (4c, tm): batch on lanes.
    h = jax.lax.dot_general(
        w_ref[...], x_ref[...],
        dimension_numbers=(((1,), (1,)), ((), ())),
        preferred_element_type=jnp.float32)
    h = h + b_ref[...]                               # bias broadcast across lanes

    c2 = h.shape[0] // 2                             # 2 * c_dim  (sublane split)
    y = h[:c2, :] * jax.nn.sigmoid(h[c2:, :])        # GLU (sigmoid hits the EUP)

    cd = c2 // 2                                     # c_dim
    mu = y[:cd, :]
    logvar = y[cd:, :]
    c_code = eps_ref[...].astype(jnp.float32) * jnp.exp(0.5 * logvar) + mu

    # Single (3*c_dim, tm) slab -> one lane-dense writeback stream per grid step.
    out_ref[...] = jnp.concatenate([c_code, mu, logvar], axis=0).astype(out_ref.dtype)


def _pick_tile(B):
    """Batch-axis (lane) tile size."""
    if B < 2 * _MIN_TM:
        return B                    # single block: block_shape == full array
    tm = pl.cdiv(B, 2)              # >=2 grid steps so "parallel" uses both v7x TCs
    tm = ((tm + _LANE - 1) // _LANE) * _LANE
    return min(_MAX_TM, tm)


def ca_net_forward(text_embedding, fc_w, fc_b, eps_t, *, compute_dtype=jnp.float32):
    """CA_NET.forward.

    Args:
      text_embedding: (B, t_dim)
      fc_w: (4*c_dim, t_dim)   torch nn.Linear weight layout (no transpose needed)
      fc_b: (4*c_dim,)
      eps_t: (c_dim, B)        N(0,1) noise, already batch-on-lane-axis
      compute_dtype: float32 (default, matches torch) or bfloat16 (halves input
                     HBM traffic on this memory-bound kernel).
    Returns:
      (c_code, mu, logvar), each (B, c_dim) float32.
    """
    B, t_dim = text_embedding.shape
    n4 = fc_w.shape[0]                                # 4 * c_dim
    c_dim = n4 // 4
    assert eps_t.shape == (c_dim, B)

    x = text_embedding.astype(compute_dtype)
    w = fc_w.astype(compute_dtype)                    # torch layout as-is
    b = fc_b.reshape(n4, 1).astype(jnp.float32)
    eps_t = eps_t.astype(compute_dtype)

    tm = _pick_tile(B)
    n_steps = pl.cdiv(B, tm)
    Bp = n_steps * tm
    if Bp != B:                                       # ragged tail -> pad, slice later
        x = jnp.pad(x, ((0, Bp - B), (0, 0)))
        eps_t = jnp.pad(eps_t, ((0, 0), (0, Bp - B)))

    slab = pl.pallas_call(
        _ca_net_kernel,
        grid=(n_steps,),
        in_specs=[
            pl.BlockSpec((tm, t_dim), lambda i: (i, 0)),      # x rows
            pl.BlockSpec((n4, t_dim), lambda i: (0, 0)),      # W (whole, resident)
            pl.BlockSpec((n4, 1), lambda i: (0, 0)),          # bias
            pl.BlockSpec((c_dim, tm), lambda i: (0, i)),      # eps (batch on lanes)
        ],
        out_specs=pl.BlockSpec((3 * c_dim, tm), lambda i: (0, i)),
        out_shape=jax.ShapeDtypeStruct((3 * c_dim, Bp), jnp.float32),
        compiler_params=pltpu.CompilerParams(
            dimension_semantics=("parallel",)),
    )(x, w, b, eps_t)

    # Layout plumbing back to the module's (B, c_dim) contract (outside the kernel).
    c_code = slab[:c_dim, :B].T
    mu = slab[c_dim:2 * c_dim, :B].T
    logvar = slab[2 * c_dim:, :B].T
    return c_code, mu, logvar


if __name__ == "__main__":
    key = jax.random.PRNGKey(0)
    kw, kb, kx, ke, kx2, ke2 = jax.random.split(key, 6)

    fc_w = 0.05 * jax.random.normal(kw, (4 * COND_DIM, EMBED_DIM), jnp.float32)
    fc_b = 0.05 * jax.random.normal(kb, (4 * COND_DIM,), jnp.float32)

    def ref(x, eps_t):
        h = x @ fc_w.T + fc_b
        y = h[:, :2 * COND_DIM] * jax.nn.sigmoid(h[:, 2 * COND_DIM:])
        mu = y[:, :COND_DIM]
        lv = y[:, COND_DIM:]
        c = eps_t.T * jnp.exp(0.5 * lv) + mu
        return c, mu, lv

    fwd = jax.jit(ca_net_forward)

    ok = True
    # (small default shape) and (a tiled/padded shape exercising grid=2 + ragged tail)
    for (B, kxi, kei) in [(BATCH, kx, ke), (1100, kx2, ke2)]:
        x = jax.random.normal(kxi, (B, EMBED_DIM), jnp.float32)
        # eps generated already transposed: (c_dim, B), batch on the lane axis
        eps_t = jax.random.normal(kei, (COND_DIM, B), jnp.float32)
        c_code, mu, logvar = fwd(x, fc_w, fc_b, eps_t)
        jax.block_until_ready((c_code, mu, logvar))

        c_r, mu_r, lv_r = ref(x, eps_t)
        ok &= c_code.shape == (B, COND_DIM)
        ok &= mu.shape == (B, COND_DIM) and logvar.shape == (B, COND_DIM)
        ok &= bool(jnp.all(jnp.isfinite(c_code)))
        ok &= bool(jnp.allclose(mu, mu_r, atol=1e-5, rtol=1e-5))
        ok &= bool(jnp.allclose(logvar, lv_r, atol=1e-5, rtol=1e-5))
        ok &= bool(jnp.allclose(c_code, c_r, atol=1e-5, rtol=1e-5))

    assert ok
    print("KERNEL_OK")
</pallas_src>

<mosaic_0001>
module attributes {stable_mosaic.version = 11 : i64} {
  func.func @_ca_net_kernel(%arg0: i32, %arg1: memref<2x16xf32, #tpu.memory_space<vmem>>, %arg2: memref<32x16xf32, #tpu.memory_space<vmem>>, %arg3: memref<32x1xf32, #tpu.memory_space<vmem>>, %arg4: memref<8x2xf32, #tpu.memory_space<vmem>>, %arg5: memref<24x2xf32, #tpu.memory_space<vmem>>) attributes {dimension_semantics = [#tpu.dimension_semantics<parallel>], iteration_bounds = array<i64: 1>, scalar_prefetch = 0 : i64, scratch_operands = 0 : i64, tpu.core_type = #tpu.core_type<tc>, window_params = [{transform_indices = @transform_0, window_bounds = array<i64: 2, 16>}, {pipeline_mode = #tpu.pipeline_mode<synchronous>, transform_indices = @transform_1, window_bounds = array<i64: 32, 16>}, {pipeline_mode = #tpu.pipeline_mode<synchronous>, transform_indices = @transform_2, window_bounds = array<i64: 32, 1>}, {transform_indices = @transform_3, window_bounds = array<i64: 8, 2>}, {transform_indices = @transform_4, window_bounds = array<i64: 24, 2>}]} {
    %c0 = arith.constant 0 : index
    %c0_0 = arith.constant 0 : index
    %0 = vector.load %arg2[%c0, %c0_0] : memref<32x16xf32, #tpu.memory_space<vmem>>, vector<32x16xf32>
    %c0_1 = arith.constant 0 : index
    %c0_2 = arith.constant 0 : index
    %1 = vector.load %arg1[%c0_1, %c0_2] : memref<2x16xf32, #tpu.memory_space<vmem>>, vector<2x16xf32>
    %cst = arith.constant dense<0.000000e+00> : vector<32x2xf32>
    %2 = tpu.matmul %0, %1, %cst {dimension_numbers = #tpu.dot_dimension_numbers<[1], [1], [0], [0], [0, 0, 1, 0], [], []>} : vector<32x16xf32>, vector<2x16xf32>, vector<32x2xf32> -> vector<32x2xf32>
    %c0_3 = arith.constant 0 : index
    %c0_4 = arith.constant 0 : index
    %3 = vector.load %arg3[%c0_3, %c0_4] : memref<32x1xf32, #tpu.memory_space<vmem>>, vector<32x1xf32>
    %4 = vector.broadcast %3 : vector<32x1xf32> to vector<32x2xf32>
    %5 = arith.addf %2, %4 : vector<32x2xf32>
    %6 = vector.extract_strided_slice %5 {offsets = [0, 0], sizes = [16, 2], strides = [1, 1]} : vector<32x2xf32> to vector<16x2xf32>
    %7 = vector.extract_strided_slice %5 {offsets = [16, 0], sizes = [16, 2], strides = [1, 1]} : vector<32x2xf32> to vector<16x2xf32>
    %8 = arith.negf %7 : vector<16x2xf32>
    %9 = math.exp %8 : vector<16x2xf32>
    %cst_5 = arith.constant 1.000000e+00 : f32
    %10 = vector.broadcast %cst_5 : f32 to vector<16x2xf32>
    %11 = arith.addf %10, %9 : vector<16x2xf32>
    %12 = arith.divf %10, %11 : vector<16x2xf32>
    %13 = arith.mulf %6, %12 : vector<16x2xf32>
    %14 = vector.extract_strided_slice %13 {offsets = [0, 0], sizes = [8, 2], strides = [1, 1]} : vector<16x2xf32> to vector<8x2xf32>
    %15 = vector.extract_strided_slice %13 {offsets = [8, 0], sizes = [8, 2], strides = [1, 1]} : vector<16x2xf32> to vector<8x2xf32>
    %c0_6 = arith.constant 0 : index
    %c0_7 = arith.constant 0 : index
    %16 = vector.load %arg4[%c0_6, %c0_7] : memref<8x2xf32, #tpu.memory_space<vmem>>, vector<8x2xf32>
    %cst_8 = arith.constant 5.000000e-01 : f32
    %17 = vector.broadcast %cst_8 : f32 to vector<8x2xf32>
    %18 = arith.mulf %17, %15 : vector<8x2xf32>
    %19 = math.exp %18 : vector<8x2xf32>
    %20 = arith.mulf %16, %19 : vector<8x2xf32>
    %21 = arith.addf %20, %14 : vector<8x2xf32>
    %22 = tpu.concatenate %21, %14, %15 in 0 : vector<8x2xf32>, vector<8x2xf32>, vector<8x2xf32> -> vector<24x2xf32>
    %c0_9 = arith.constant 0 : index
    %c0_10 = arith.constant 0 : index
    %23 = vector.load %arg5[%c0_9, %c0_10] : memref<24x2xf32, #tpu.memory_space<vmem>>, vector<24x2xf32>
    tpu.vector_store %arg5[%c0_9, %c0_10], %22 {strides = array<i32>} : memref<24x2xf32, #tpu.memory_space<vmem>>, vector<24x2xf32>,
    return
  }
  func.func @transform_0(%arg0: i32) -> (i32, i32) {
    %c0_i32 = arith.constant 0 : i32
    %c0_i32_0 = arith.constant 0 : i32
    return %arg0, %c0_i32 : i32, i32
  }
  func.func @transform_1(%arg0: i32) -> (i32, i32) {
    %c0_i32 = arith.constant 0 : i32
    %c0_i32_0 = arith.constant 0 : i32
    %c0_i32_1 = arith.constant 0 : i32
    return %c0_i32, %c0_i32_0 : i32, i32
  }
  func.func @transform_2(%arg0: i32) -> (i32, i32) {
    %c0_i32 = arith.constant 0 : i32
    %c0_i32_0 = arith.constant 0 : i32
    %c0_i32_1 = arith.constant 0 : i32
    return %c0_i32, %c0_i32_0 : i32, i32
  }
  func.func @transform_3(%arg0: i32) -> (i32, i32) {
    %c0_i32 = arith.constant 0 : i32
    %c0_i32_0 = arith.constant 0 : i32
    return %c0_i32, %arg0 : i32, i32
  }
  func.func @transform_4(%arg0: i32) -> (i32, i32) {
    %c0_i32 = arith.constant 0 : i32
    %c0_i32_0 = arith.constant 0 : i32
    return %c0_i32, %arg0 : i32, i32
  }
}

</mosaic_0001>

<bundles_post_ra>
// kernel: ca_net_forward.1
= control target key start
LH: loop header
LB: loop body
LE: loop exit
PB: predicated region body
PF: predicated region fallthrough
CT: control target
= control target key end

     0   :  { %vm46_vm0 = vcmask 130048   ;;  %v168_v1 = vmov 0   ;;  %vm137_vm8 = vcmask 15360   ;;  %s244_s0 = inlined_call_operand.vmem [shape: f32[2,16], index: 0, kind: input, shape index: {}]   ;;  %s245_s1 = inlined_call_operand.vmem [shape: f32[32,16], index: 1, kind: input, shape index: {}]   ;;  %s246_s2 = inlined_call_operand.vmem [shape: f32[32,1], index: 2, kind: input, shape index: {}]   ;;  %s247_s4 = inlined_call_operand.vmem [shape: f32[24,2], index: 4, kind: output, shape index: {}]   ;;  %s248_s3 = inlined_call_operand.vmem [shape: f32[8,2], index: 3, kind: input, shape index: {}]  }
   0x1   :  { %v21_v0 = vld [vmem:[%s244_s0] sm:$0x3]  ;;  %156 = vset.pattern.permute.xlu0 %v168_v1  ;;  %157 = vset.pattern.permute.xlu1 %v168_v1  ;;  %v19_v2 = vld [vmem:[%s245_s1 + $0x10] sm:$0xff]  ;;  %v20_v3 = vld [vmem:[%s245_s1 + $0x18] sm:$0xff] }
   0x2   :  { %153 = vmatpush.xpose.msk.msra.mxu2 %vm46_vm0, %v21_v0  ;;  %154 = vmatpush.xpose.msk.msra.mxu3 %vm46_vm0, %v21_v0  ;;  %v25_v4 = vld [vmem:[%s246_s2 + $0x18] sm:$0xff]  ;;  %v17_v5 = vld [vmem:[%s245_s1] sm:$0xff]  ;;  %v23_v6 = vld [vmem:[%s246_s2 + $0x8] sm:$0xff] }
   0x3   :  { %43 = vperm.xlu0 %156, %v25_v4   ;;  %145 = vmatpush.xpose.msk.msra.mxu0 %vm46_vm0, %v21_v0  ;;  %v18_v7 = vld [vmem:[%s245_s1 + $0x8] sm:$0xff]  ;;  %v24_v8 = vld [vmem:[%s246_s2 + $0x10] sm:$0xff]  ;;  %v22_v9 = vld [vmem:[%s246_s2] sm:$0xff] }
   0x4   :  { %152 = vmatpush.xpose.msk.msra.mxu1 %vm46_vm0, %v21_v0  ;;  %33 = vperm.xlu1 %157, %v23_v6   ;;  %v131_v52 = vld [vmem:[%s248_s3] sm:$0xff] }
   0x5   :  { %148 = vmatmul.msk.f32.vlgmr.msra.gmra.mxu2 %vm46_vm0, %v19_v2  ;;  %149 = vmatmul.msk.f32.vlgmr.msra.gmra.mxu3 %vm46_vm0, %v20_v3 }
   0x6   :  { %146 = vmatmul.msk.f32.vlgmr.msra.gmra.mxu0 %vm46_vm0, %v17_v5 }
   0x7   :  { %147 = vmatmul.msk.f32.vlgmr.msra.gmra.mxu1 %vm46_vm0, %v18_v7 }
   0xb   :  { %38 = vperm.xlu0 %156, %v24_v8  }
   0xc   :  { %28 = vperm.xlu1 %157, %v22_v9  }
  0x75   :  { %v44_v10 = vpop.permute.xlu0 %43 }
  0x76   :  { %v34_v22 = vpop.permute.xlu1 %33 }
  0x7d   :  { %v39_v11 = vpop.permute.xlu0 %38 }
  0x7e   :  { %v29_v28 = vpop.permute.xlu1 %28 }
  0x83   :  { %v79_v29 = vpop.f32.mrf.mxu0 }
  0x84   :  { %v82_v34 = vpop.f32.mrf.mxu1  ;;  %v80_v38 = vadd.f32 %v79_v29, %v29_v28 }
  0x85   :  { %v83_v41 = vadd.f32 %v82_v34, %v34_v22 }
  0x88   :  { %v85_v12 = vpop.f32.mrf.mxu2  ;;  %v88_v13 = vpop.f32.mrf.mxu3 }
  0x89   :  { %v86_v14 = vadd.f32 %v85_v12, %v39_v11  ;;  %v89_v15 = vadd.f32 %v88_v13, %v44_v10 }
  0x8b   :  { %v150_v16 = vmul.f32 -1.442695, %v86_v14  ;;  %v151_v17 = vmul.f32 -1.442695, %v89_v15 }
  0x8d   :  { %158 = vpow2.f32 %v150_v16 }
  0x8e   :  { %160 = vpow2.f32 %v151_v17 }
  0x93   :  { %v159_v18 = vpop.eup %158 }
  0x94   :  { %v161_v19 = vpop.eup %160  ;;  %v97_v20 = vadd.f32 1.0, %v159_v18 }
  0x95   :  { %v98_v21 = vadd.f32 1.0, %v161_v19 }
  0x96   :  { %162 = vrcp.f32 %v97_v20  ;;  %v110_v30 = vand.u32 2147483648, %v97_v20  ;;  %v108_v33 = vand.u32 2147483647, %v97_v20  ;;  %vm104_vm3 = vweird.f32 %v97_v20 }
  0x97   :  { %164 = vrcp.f32 %v98_v21  ;;  %v125_v35 = vand.u32 2147483648, %v98_v21  ;;  %v123_v37 = vand.u32 2147483647, %v98_v21  ;;  %vm119_vm5 = vweird.f32 %v98_v21 }
  0x98   :  { %v111_v40 = vor.u32 1.1754944e-38, %v110_v30  ;;  %vm109_vm6 = vcmp.eq.f32.partialorder %v108_v33, 8.507059e+37 }
  0x99   :  { %v126_v44 = vor.u32 1.1754944e-38, %v125_v35  ;;  %vm124_vm9 = vcmp.eq.f32.partialorder %v123_v37, 8.507059e+37 }
  0x9c   :  { %v163_v23 = vpop.eup %162 }
  0x9d   :  { %v165_v24 = vpop.eup %164  ;;  %v100_v25 = vmul.f32 %v163_v23, %v97_v20  ;;  %vm105_vm1 = vweird.f32 %v163_v23 }
  0x9e   :  { %v115_v26 = vmul.f32 %v165_v24, %v98_v21  ;;  %vm120_vm2 = vweird.f32 %v165_v24  ;;  %vm106_vm4 = vmor %vm104_vm3, %vm105_vm1 }
  0x9f   :  { %v101_v27 = vsub.f32 1.0, %v100_v25  ;;  %vm121_vm7 = vmor %vm119_vm5, %vm120_vm2 }
  0xa0   :  { %v116_v31 = vsub.f32 1.0, %v115_v26 }
  0xa1   :  { %v102_v32 = vmul.f32 %v163_v23, %v101_v27 }
  0xa2   :  { %v117_v36 = vmul.f32 %v165_v24, %v116_v31 }
  0xa3   :  { %v103_v39 = vadd.f32 %v163_v23, %v102_v32 }
  0xa4   :  { %v118_v42 = vadd.f32 %v165_v24, %v117_v36 }
  0xa5   :  { %v107_v43 = vsel %vm106_vm4, %v163_v23, %v103_v39 }
  0xa6   :  { %v112_v45 = vsel %vm109_vm6, %v111_v40, %v107_v43  ;;  %v122_v46 = vsel %vm121_vm7, %v165_v24, %v118_v42 }
  0xa7   :  { %v129_v47 = vmul.f32 %v112_v45, %v80_v38  ;;  %v127_v48 = vsel %vm124_vm9, %v126_v44, %v122_v46 }
  0xa8   :  { %v130_v49 = vmul.f32 %v127_v48, %v83_v41 }
  0xa9   :  { %139 = vst.msk [vmem:[%s247_s4 + $0x8] sm:$0xff] %vm137_vm8, %v129_v47 }
  0xaa   :  { %v132_v50 = vmul.f32 0.5, %v130_v49  ;;  %140 = vst.msk [vmem:[%s247_s4 + $0x10] sm:$0xff] %vm137_vm8, %v130_v49 }
  0xac   :  { %v133_v51 = vmul.f32 1.442695, %v132_v50 }
  0xae   :  { %166 = vpow2.f32 %v133_v51 }
  0xb4   :  { %v167_v53 = vpop.eup %166 }
  0xb5   :  { %v135_v54 = vmul.f32 %v167_v53, %v131_v52 }
  0xb7   :  { %v136_v55 = vadd.f32 %v135_v54, %v129_v47 }
  0xb9   :  { %138 = vst.msk [vmem:[%s247_s4] sm:$0xff] %vm137_vm8, %v136_v55 }

</bundles_post_ra>
